<compile_context>
chip_gen: v7x
topology: tpu7x:2x2x1
jax: 0.10.0
libtpu: 0.0.40
codegen_flags: <defaults>
</compile_context>

<pallas_src>
import functools

import jax
import jax.numpy as jnp
from jax.experimental import pallas as pl
from jax.experimental.pallas import tpu as pltpu


_LANE = 128
_MAX_TR = 1024                       # rows per block (multiple of 128)
_BLOCK_BUDGET_BYTES = 4 * 1024 * 1024  # per input block; x2 for double-buffering


def _spatial_mean_kernel(x_ref, o_ref, *, inv_hw):
    # x_ref: (TR, hw) input block in VMEM; o_ref: (1, TR) lane-dense output.
    x = x_ref[...].astype(jnp.float32)               # f32 accumulation (bf16-safe)
    s = jnp.sum(x, axis=1, keepdims=True)            # (TR, 1) row sums
    # Transpose to a lane-dense row so the store is an unmasked, dense vst
    # (XLU has plenty of slack in this memory-bound kernel).
    o_ref[...] = (s * inv_hw).T.astype(o_ref.dtype)  # (1, TR)


def spatial_mean(x):
    """Equivalent of x.mean((2, 3), keepdim=True) for NCHW input."""
    n, c, h, w = x.shape
    rows = n * c
    hw = h * w
    itemsize = jnp.dtype(x.dtype).itemsize
    x2d = x.reshape(rows, hw)

    # Pick a row tile: lane-dense (multiple of 128) and sized so that
    # 2 (double-buffer) x TR x hw x itemsize stays well under the scoped-VMEM
    # default on v5e/v6e/v7x.
    tr = _BLOCK_BUDGET_BYTES // max(1, hw * itemsize)
    tr = max(_LANE, min(_MAX_TR, (tr // _LANE) * _LANE))
    if rows <= tr:
        # Single full block: block dims equal array dims, no tiling constraints.
        tr = rows
    num_tiles = pl.cdiv(rows, tr)
    rows_padded = num_tiles * tr

    kernel = functools.partial(_spatial_mean_kernel, inv_hw=1.0 / float(hw))

    out = pl.pallas_call(
        kernel,
        out_shape=jax.ShapeDtypeStruct((1, rows_padded), x.dtype),
        grid=(num_tiles,),
        in_specs=[pl.BlockSpec((tr, hw), lambda i: (i, 0))],
        out_specs=pl.BlockSpec((1, tr), lambda i: (0, i)),
        compiler_params=pltpu.CompilerParams(
            # Row tiles are independent -> shard the grid across TensorCores
            # (matters on v7x with 2 TCs/chip).
            dimension_semantics=("parallel",),
        ),
        cost_estimate=pl.CostEstimate(
            flops=rows * hw,
            transcendentals=0,
            bytes_accessed=rows * hw * itemsize + rows * itemsize,
        ),
    )(x2d)

    # Drop any padded tail rows (ragged last block) and restore NCHW keepdim.
    return out[0, :rows].reshape(n, c, 1, 1)


if __name__ == "__main__":
    key = jax.random.PRNGKey(0)
    k1, k2, k3 = jax.random.split(key, 3)

    # 1) Small shape consistent with the module's NCHW squeeze-excite input.
    x_small = jax.random.normal(k1, (2, 16, 14, 14), dtype=jnp.float32)
    y_small = spatial_mean(x_small)
    jax.block_until_ready(y_small)
    ref_small = jnp.mean(x_small, axis=(2, 3), keepdims=True)
    assert y_small.shape == ref_small.shape
    assert jnp.allclose(y_small, ref_small, atol=1e-5, rtol=1e-5)

    # 2) Exercise the tiled + ragged-tail path (rows = 2100 > 1024-row tile).
    x_tiled = jax.random.normal(k2, (3, 700, 14, 14), dtype=jnp.float32)
    y_tiled = spatial_mean(x_tiled)
    jax.block_until_ready(y_tiled)
    ref_tiled = jnp.mean(x_tiled, axis=(2, 3), keepdims=True)
    assert y_tiled.shape == ref_tiled.shape
    assert jnp.allclose(y_tiled, ref_tiled, atol=1e-5, rtol=1e-5)

    # 3) bf16 I/O with f32 accumulation inside the kernel.
    x_bf16 = jax.random.normal(k3, (2, 16, 14, 14), dtype=jnp.bfloat16)
    y_bf16 = spatial_mean(x_bf16)
    jax.block_until_ready(y_bf16)
    ref_bf16 = jnp.mean(x_bf16.astype(jnp.float32), axis=(2, 3),
                        keepdims=True).astype(jnp.bfloat16)
    assert y_bf16.dtype == jnp.bfloat16
    assert jnp.allclose(y_bf16.astype(jnp.float32),
                        ref_bf16.astype(jnp.float32), atol=2e-2, rtol=2e-2)

    print("KERNEL_OK")
</pallas_src>

<mosaic_0001>
module attributes {stable_mosaic.version = 11 : i64} {
  func.func @_spatial_mean_kernel(%arg0: i32, %arg1: memref<32x196xf32, #tpu.memory_space<vmem>>, %arg2: memref<1x32xf32, #tpu.memory_space<vmem>>) attributes {dimension_semantics = [#tpu.dimension_semantics<parallel>], iteration_bounds = array<i64: 1>, scalar_prefetch = 0 : i64, scratch_operands = 0 : i64, tpu.core_type = #tpu.core_type<tc>, window_params = [{transform_indices = @transform_0, window_bounds = array<i64: 32, 196>}, {transform_indices = @transform_1, window_bounds = array<i64: 1, 32>}]} {
    %c0 = arith.constant 0 : index
    %c0_0 = arith.constant 0 : index
    %0 = vector.load %arg1[%c0, %c0_0] : memref<32x196xf32, #tpu.memory_space<vmem>>, vector<32x196xf32>
    %cst = arith.constant dense<0.000000e+00> : vector<32xf32>
    %1 = vector.multi_reduction <add>, %0, %cst [1] : vector<32x196xf32> to vector<32xf32>
    %2 = vector.shape_cast %1 : vector<32xf32> to vector<32x1xf32>
    %cst_1 = arith.constant 0.00510204071 : f32
    %3 = vector.broadcast %cst_1 : f32 to vector<32x1xf32>
    %4 = arith.mulf %2, %3 : vector<32x1xf32>
    %5 = tpu.transpose %4, [1, 0] : vector<32x1xf32> -> vector<1x32xf32>
    %c0_2 = arith.constant 0 : index
    %c0_3 = arith.constant 0 : index
    %6 = vector.load %arg2[%c0_2, %c0_3] : memref<1x32xf32, #tpu.memory_space<vmem>>, vector<1x32xf32>
    tpu.vector_store %arg2[%c0_2, %c0_3], %5 {strides = array<i32>} : memref<1x32xf32, #tpu.memory_space<vmem>>, vector<1x32xf32>,
    return
  }
  func.func @transform_0(%arg0: i32) -> (i32, i32) {
    %c0_i32 = arith.constant 0 : i32
    %c0_i32_0 = arith.constant 0 : i32
    return %arg0, %c0_i32 : i32, i32
  }
  func.func @transform_1(%arg0: i32) -> (i32, i32) {
    %c0_i32 = arith.constant 0 : i32
    %c0_i32_0 = arith.constant 0 : i32
    return %c0_i32, %arg0 : i32, i32
  }
}

</mosaic_0001>

<bundles_post_ra>
// kernel: tpu_custom_call.1
= control target key start
LH: loop header
LB: loop body
LE: loop exit
PB: predicated region body
PF: predicated region fallthrough
CT: control target
= control target key end

     0   :  { %6 = vsyncpa [#allocation3], 0  ;;  %s192_s0 = inlined_call_operand.hbm [shape: f32[32,196], index: 0, kind: input, shape index: {}]   ;;  %s193_s1 = inlined_call_operand.hbm [shape: f32[1,32], index: 1, kind: output, shape index: {}]  }
   0x1   :  { %7 = vsyncpa [#allocation4], 0  ;;  %s154_s6 = smov [#allocation2]   ;;  %s106_s10 = scalar_lea.hbm %s192_s0, 1024 }
   0x2   :  { %s13_s7 = sshll.u32 %s154_s6, 4  ;;  %p107_p0 = scmp.ne.s32.totalorder %s192_s0, %s106_s10  ;;  %s14_s7 = int_to_ptr.vmem [resolvable:$true] %s13_s7 }
   0x3   :  { %p110_p1 = scmp.lt.u32.totalorder %s106_s10, %s192_s0 }
   0x5   :  { %p112_p2 = pnand %p110_p1, %p107_p0 }
   0x7   :  { %115 = shalt.err (!%p112_p2)
}
   0x8   :  { %s116_s15 = scalar_lea.vmem %s14_s7, 1024  ;;  %p121_p4 = scmp.lt.s32.totalorder %s14_s7, %s14_s7 }
   0x9   :  { %p117_p3 = scmp.ne.s32.totalorder %s14_s7, %s116_s15  ;;  %p122_p5 = scmp.lt.s32.totalorder %s116_s15, %s116_s15 }
   0xb   :  { %p123_p6 = por %p122_p5, %p121_p4 }
   0xd   :  { %p124_p7 = pnand %p123_p6, %p117_p3 }
   0xf   :  { %127 = shalt.err (!%p124_p7)
}
  0x10   :  { %s155_s16 = smov 256   ;;  %s156_s17 = smov 16  }
  0x11   :  { %19 = dma.hbm_to_vmem [thread:$0]  %s192_s0, 1024, %s14_s7, [#allocation3], %s155_s16, %s155_s16, %s156_s17  }
  0x12   :  { %150 = dma.done.wait [#allocation3], 1024  }
  0x13   :  { %151 = vsyncadd [#allocation3], 4294966272  ;;  %vm31_vm0 = vcmask 556032   ;;  %v23_v0 = vld [vmem:[#allocation2] sm:$0xff]  ;;  %v24_v1 = vld [vmem:[#allocation2 + $0x8] sm:$0xff]  ;;  %s157_s0 = smov [#allocation5]  }
  0x14   :  { %v25_v2 = vld [vmem:[#allocation2 + $0x10] sm:$0xff]  ;;  %v32_v3 = vsel %vm31_vm0, %v24_v1, 0.0  ;;  %v26_v4 = vld [vmem:[#allocation2 + $0x18] sm:$0xff]  ;;  %v27_v5 = vld [vmem:[#allocation2 + $0x20] sm:$0xff]  ;;  %s92_s20 = sshll.u32 %s157_s0, 4  ;;  %vm84_vm1 = vcmask 253952   ;;  %s93_s20 = int_to_ptr.vmem [resolvable:$true] %s92_s20 }
  0x15   :  { %v28_v6 = vld [vmem:[#allocation2 + $0x28] sm:$0xff]  ;;  %v33_v7 = vadd.f32 %v32_v3, %v23_v0  ;;  %v36_v8 = vsel %vm31_vm0, %v26_v4, 0.0  ;;  %v29_v10 = vld [vmem:[#allocation2 + $0x30] sm:$0xff]  ;;  %v30_v11 = vld [vmem:[#allocation2 + $0x38] sm:$0xff]  ;;  %s128_s21 = scalar_lea.vmem %s93_s20, 16  ;;  %s132_s22 = scalar_lea.vmem %s93_s20, 32 }
  0x16   :  { %v40_v9 = vsel %vm31_vm0, %v28_v6, 0.0  ;;  %v44_v13 = vsel %vm31_vm0, %v30_v11, 0.0  ;;  %v37_v14 = vadd.f32 %v36_v8, %v25_v2  ;;  %p129_p8 = scmp.ne.s32.totalorder %s93_s20, %s128_s21  ;;  %p133_p9 = scmp.lt.s32.totalorder %s93_s20, %s93_s20 }
  0x17   :  { %v41_v12 = vadd.f32 %v40_v9, %v27_v5  ;;  %34 = vadd.xlane.f32.xlu0 %v33_v7  ;;  %v45_v15 = vadd.f32 %v44_v13, %v29_v10  ;;  %p134_p10 = scmp.lt.s32.totalorder %s132_s22, %s128_s21 }
  0x19   :  { %42 = vadd.xlane.f32.xlu1 %v41_v12  ;;  %p135_p11 = por %p134_p10, %p133_p9 }
  0x1b   :  { %38 = vadd.xlane.f32.xlu0 %v37_v14  ;;  %p136_p12 = pnand %p135_p11, %p129_p8 }
  0x1d   :  { %46 = vadd.xlane.f32.xlu1 %v45_v15 }
  0xa4   :  { %v35_v16 = vpop.xlane.xlu0 %34 }
  0xa5   :  { %v48_v17 = vmul.f32 0.0051020407, %v35_v16 }
  0xa6   :  { %v43_v18 = vpop.xlane.xlu1 %42 }
  0xa7   :  { %52 = vxpose.xlu0.b32.start [1/4] (short) (narrow) %v48_v17, 8  ;;  %v50_v21 = vmul.f32 0.0051020407, %v43_v18 }
  0xa8   :  { %v39_v19 = vpop.xlane.xlu0 %38 }
  0xa9   :  { %v49_v20 = vmul.f32 0.0051020407, %v39_v19 }
  0xaa   :  { %v47_v22 = vpop.xlane.xlu1 %46 }
  0xab   :  { %53 = vxpose.xlu0.b32.cont [2/4] (short) (narrow) %v49_v20, 8  ;;  %v51_v23 = vmul.f32 0.0051020407, %v47_v22 }
  0xaf   :  { %54 = vxpose.xlu0.b32.cont [3/4] (short) (narrow) %v50_v21, 8 }
  0xb3   :  { %55 = vxpose.xlu0.b32.end [4/4] (short) (narrow) %v51_v23, 8 }
 0x127   :  { %v68_v24 = vpop.trf.xlu0 }
 0x128   :  { %85 = vst.msk [vmem:[#allocation5] sm:$0x1] %vm84_vm1, %v68_v24 }
 0x129   :  { %139 = shalt.err (!%p136_p12)
}
 0x12a   :  { %s140_s25 = scalar_lea.hbm %s193_s1, 16 }
 0x12b   :  { %p141_p13 = scmp.ne.s32.totalorder %s193_s1, %s140_s25  ;;  %p144_p0 = scmp.lt.u32.totalorder %s140_s25, %s193_s1 }
 0x12d   :  { %p146_p1 = pnand %p144_p0, %p141_p13 }
 0x12f   :  { %149 = shalt.err (!%p146_p1)
}
 0x130   :  { %95 = dma.vmem_to_hbm [thread:$0]  %s93_s20, 16, %s193_s1, [#allocation4]  }
 0x131   :  { %152 = dma.done.wait [#allocation4], 16  }
 0x132   :  { %153 = vsyncadd [#allocation4], 4294967280 }
 0x133   :  { %99 = vsyncpa [#allocation3], 1 }
 0x134   :  { %100 = vsyncpa [#allocation4], 1 }

</bundles_post_ra>
